<compile_context>
chip_gen: v6e
topology: v6e:2x2x1
jax: 0.10.0
libtpu: 0.0.40
codegen_flags: <defaults>
</compile_context>

<pallas_src>
import functools
import math

import numpy as np

import jax
import jax.numpy as jnp
from jax.experimental import pallas as pl
from jax.experimental.pallas import tpu as pltpu


def _round_up(x, m):
    return ((x + m - 1) // m) * m


def _pad2(x, rows, cols):
    return jnp.pad(x, ((0, rows - x.shape[0]), (0, cols - x.shape[1])))


def _vmem_cap_bytes():
    try:
        cap = int(pltpu.get_tpu_info().vmem_capacity_bytes)
    except Exception:
        cap = 64 * 1024 * 1024          # conservative (v7x per-TC physical)
    return int(cap * 0.85)


# ---------------------------------------------------------------------------
# Fused kernel: grid=(num_timestamps,), whole forward pass in one pallas_call
#
# Slab layouts:
#   raw slab (Fh lanes): his raw at cols [0, day-1), cur raw at col day-1
#   H / pos / emb / mix slabs (Fh lanes): his at [0, fout_h), cur at fout_h
#   output slab (Fo lanes): final embeddings at cols [0, T*out_size)
# ---------------------------------------------------------------------------

def _combined_gnn_kernel(a_hbm_ref, raw_ref, pos_ref, w0_ref, wmid_ref,
                         wtail_ref, o_ref, a_vmem, a_sem, mix_acc_ref,
                         *, n_layers, fh):
    t = pl.program_id(0)

    @pl.when(t == 0)
    def _init():
        # Single-buffered, grid-invariant adjacency: one DMA, resident after.
        cp = pltpu.make_async_copy(a_hbm_ref, a_vmem, a_sem)
        cp.start()
        cp.wait()
        mix_acc_ref[...] = jnp.zeros_like(mix_acc_ref)
        o_ref[...] = jnp.zeros_like(o_ref)

    a = a_vmem[...]                                           # (Np, Np) bf16

    # pre-latent embeddings from timestamps < t  (his | cur lane regions)
    emb = jnp.maximum(mix_acc_ref[...], 0.0).astype(jnp.bfloat16)

    # ---- GNN layer 0: fused K = 2*Fh dot (raw | emb), shared A aggregation
    xin = jnp.concatenate([raw_ref[0], emb], axis=-1)         # (Np, 2*Fh) bf16
    xw = jnp.dot(xin, w0_ref[0], preferred_element_type=jnp.float32)
    h = jnp.maximum(
        jnp.dot(a, xw.astype(jnp.bfloat16), preferred_element_type=jnp.float32),
        0.0)

    # ---- remaining GNN layers ----------------------------------------------
    for layer in range(n_layers - 1):
        xw = jnp.dot(h.astype(jnp.bfloat16), wmid_ref[0, layer],
                     preferred_element_type=jnp.float32)
        h = jnp.maximum(
            jnp.dot(a, xw.astype(jnp.bfloat16),
                    preferred_element_type=jnp.float32),
            0.0)

    # positional term is added to the GNN output (CombinedGNN semantics)
    h = h + pos_ref[0].astype(jnp.float32)
    hb = h.astype(jnp.bfloat16)

    # fused tail: [ mixing (Fh lanes) | final projection (Fo lanes) ]
    tail = jnp.dot(hb, wtail_ref[0], preferred_element_type=jnp.float32)
    mix_acc_ref[...] += tail[:, :fh]            # running his/cur mixing sum
    o_ref[...] += tail[:, fh:]                  # resident final accumulator

    @pl.when(t == pl.num_programs(0) - 1)
    def _finalize():
        o_ref[...] = jnp.maximum(o_ref[...], 0.0)


# ---------------------------------------------------------------------------
# One-time host-side packing of parameters + adjacency (hoisted out of jit)
# ---------------------------------------------------------------------------

def pack_combined_gnn(params, a_norm, *, day, out_size, num_timestamps,
                      gnn_layers):
    T, L = num_timestamps, gnn_layers
    fin_h, fout_h = day - 1, out_size - 1
    dim = T * out_size
    Fh = _round_up(max(day, fout_h + 1, 8), 128)
    Fo = _round_up(max(dim, 8), 128)
    assert day <= Fh and fout_h + 1 <= Fh and dim <= Fo, \
        "his/cur block packing does not fit the chosen lane widths"
    n_mid = max(L - 1, 1)

    hw = np.asarray(params["his_weight"], np.float32)
    cw = np.asarray(params["cur_weight"], np.float32)
    fw = np.asarray(params["final_weight"], np.float32)

    w0 = np.zeros((T, 2 * Fh, Fh), np.float32)      # [raw rows | emb rows]
    wmid = np.zeros((T, n_mid, Fh, Fh), np.float32)
    wtail = np.zeros((T, Fh, Fh + Fo), np.float32)  # [mix cols | final cols]
    for t in range(T):
        wh = [np.asarray(w, np.float32) for w in params["his_gnn"][t]]
        wc = [np.asarray(w, np.float32) for w in params["cur_gnn"][t]]
        # layer-0: raw half
        w0[t, :fin_h, :fout_h] = wh[0][:fin_h, :]
        w0[t, fin_h, fout_h] = wc[0][0, 0]
        # layer-0: emb (pre-latent) half
        w0[t, Fh:Fh + fout_h, :fout_h] = wh[0][fin_h:, :]
        w0[t, Fh + fout_h, fout_h] = wc[0][1, 0]
        # deeper GNN layers (block-diagonal his/cur)
        for l in range(1, L):
            wmid[t, l - 1, :fout_h, :fout_h] = wh[l]
            wmid[t, l - 1, fout_h, fout_h] = wc[l][0, 0]
        # his/cur mixing column block for timestamp t
        wtail[t, :fout_h, :fout_h] = hw[:, t * fout_h:(t + 1) * fout_h].T
        wtail[t, fout_h, fout_h] = cw[0, t]
        # final-projection contribution of timestamp t
        wtail[t, :fout_h, Fh:Fh + dim] = fw[:, t * fout_h:(t + 1) * fout_h].T
        wtail[t, fout_h, Fh:Fh + dim] = fw[:, T * fout_h + t]

    tot = a_norm.shape[0]
    Np = _round_up(max(tot, 8), 128)
    a_np = np.zeros((Np, Np), np.float32)
    a_np[:tot, :tot] = np.asarray(a_norm, np.float32)

    return {
        "a": jnp.asarray(a_np, jnp.bfloat16),
        "w0": jnp.asarray(w0, jnp.bfloat16),
        "wmid": jnp.asarray(wmid, jnp.bfloat16),
        "wtail": jnp.asarray(wtail, jnp.bfloat16),
    }


# ---------------------------------------------------------------------------
# Forward wrapper: pad data once, single pallas_call
# ---------------------------------------------------------------------------

@functools.partial(
    jax.jit,
    static_argnames=("st", "day", "out_size", "num_timestamps", "gnn_layers"))
def combined_gnn_forward(packed, data, pos_data, nodes_batch,
                         st, day, out_size, num_timestamps, gnn_layers):
    assert day == out_size, "reference requires pos width == GNN output width"
    T, L = num_timestamps, gnn_layers
    dim = T * out_size
    n = nodes_batch.shape[0]

    Np = packed["a"].shape[0]
    Fh = packed["w0"].shape[2]
    Fo = packed["wtail"].shape[2] - Fh
    n_mid = packed["wmid"].shape[1]

    f32, bf16 = jnp.float32, jnp.bfloat16

    raw_slabs, pos_slabs = [], []
    for t in range(T):
        raw = data[st + t][nodes_batch][:, :day]       # his cols | cur col
        pos = pos_data[st + t][:, :day]
        raw_slabs.append(_pad2(raw.astype(f32), Np, Fh))
        pos_slabs.append(_pad2(pos.astype(f32), Np, Fh))
    raw_all = jnp.stack(raw_slabs).astype(bf16)        # (T, Np, Fh)
    pos_all = jnp.stack(pos_slabs).astype(bf16)        # (T, Np, Fh)

    # VMEM budget: A single-buffered + double-buffered streams + residents.
    vmem_need = (
        Np * Np * 2                               # A (one resident VMEM copy)
        + 2 * 2 * Np * Fh * 2                     # raw, pos (2 buffers each)
        + 2 * (2 * Fh) * Fh * 2                   # W0
        + 2 * n_mid * Fh * Fh * 2                 # Wmid
        + 2 * Fh * (Fh + Fo) * 2                  # Wtail
        + 2 * Np * Fo * 4                         # output (revisited block)
        + Np * Fh * 4                             # mix_acc scratch
        + Np * 2 * Fh * 2 + Np * (Fh + Fo) * 4    # concat / tail temporaries
    )
    vmem_limit = min(_vmem_cap_bytes(),
                     max(int(vmem_need * 1.5) + (4 << 20), 32 << 20))

    kernel = functools.partial(_combined_gnn_kernel, n_layers=L, fh=Fh)
    grid_spec = pltpu.PrefetchScalarGridSpec(
        num_scalar_prefetch=0,
        grid=(T,),
        in_specs=[
            pl.BlockSpec(memory_space=pl.ANY),                         # A (HBM)
            pl.BlockSpec((1, Np, Fh), lambda t: (t, 0, 0)),            # raw[t]
            pl.BlockSpec((1, Np, Fh), lambda t: (t, 0, 0)),            # pos[t]
            pl.BlockSpec((1, 2 * Fh, Fh), lambda t: (t, 0, 0)),        # W0[t]
            pl.BlockSpec((1, n_mid, Fh, Fh), lambda t: (t, 0, 0, 0)),  # Wmid[t]
            pl.BlockSpec((1, Fh, Fh + Fo), lambda t: (t, 0, 0)),       # Wtail[t]
        ],
        out_specs=pl.BlockSpec((Np, Fo), lambda t: (0, 0)),            # resident
        scratch_shapes=[
            pltpu.VMEM((Np, Np), bf16),          # A resident (single buffer)
            pltpu.SemaphoreType.DMA,             # A copy semaphore
            pltpu.VMEM((Np, Fh), jnp.float32),   # mix_acc (his/cur running sum)
        ],
    )
    out_pad = pl.pallas_call(
        kernel,
        grid_spec=grid_spec,
        out_shape=jax.ShapeDtypeStruct((Np, Fo), jnp.float32),
        compiler_params=pltpu.CompilerParams(
            dimension_semantics=("arbitrary",),   # sequential carry over t
            vmem_limit_bytes=vmem_limit,
        ),
    )(packed["a"], raw_all, pos_all, packed["w0"], packed["wmid"],
      packed["wtail"])

    return out_pad[:n, :dim]


# ---------------------------------------------------------------------------
# Parameter construction (mirrors the PyTorch __init__ shapes)
# ---------------------------------------------------------------------------

def _xavier(key, shape):
    fan_out, fan_in = shape
    a = math.sqrt(6.0 / (fan_in + fan_out))
    return jax.random.uniform(key, shape, jnp.float32, -a, a)


def init_params(key, input_size, out_size, num_timestamps, gnn_layers):
    fin_h, fout_h = input_size - 1, out_size - 1
    params = {"his_gnn": [], "cur_gnn": []}
    for _t in range(num_timestamps):
        his_ws, cur_ws = [], []
        for layer in range(gnn_layers):
            key, k1, k2 = jax.random.split(key, 3)
            his_in = (fin_h + fout_h) if layer == 0 else fout_h
            cur_in = (1 + 1) if layer == 0 else 1
            his_ws.append(_xavier(k1, (his_in, fout_h)))
            cur_ws.append(_xavier(k2, (cur_in, 1)))
        params["his_gnn"].append(his_ws)
        params["cur_gnn"].append(cur_ws)
    key, k1, k2, k3 = jax.random.split(key, 4)
    params["his_weight"] = _xavier(k1, (out_size - 1, num_timestamps * out_size - 1))
    params["cur_weight"] = _xavier(k2, (1, num_timestamps * 1))
    dim = num_timestamps * out_size
    params["final_weight"] = _xavier(k3, (dim, dim))
    return params


# ---------------------------------------------------------------------------
# Pure-JAX f32 reference (same stand-in GNN) for a correctness sanity check
# ---------------------------------------------------------------------------

def reference_forward(params, a_norm, data, pos_data, nodes_batch,
                      st, day, out_size, num_timestamps):
    fout_h = out_size - 1
    n = nodes_batch.shape[0]
    his_emb = jnp.zeros((n, fout_h), jnp.float32)
    cur_emb = jnp.zeros((n, 1), jnp.float32)
    historical, current = [], []

    def gnn(raw, pre, weights, pos):
        h = jnp.concatenate([raw, pre], axis=1)
        for w in weights:
            h = jnp.maximum((a_norm @ h) @ w, 0.0)
        return h + pos

    for t in range(num_timestamps):
        raw_full = data[st + t]
        pos_full = pos_data[st + t]

        his_out = gnn(raw_full[:, :day - 1][nodes_batch], his_emb,
                      params["his_gnn"][t], pos_full[:, :day - 1])
        historical.append(his_out)
        upto = jnp.concatenate(historical, axis=1)
        w = params["his_weight"][:, :(t + 1) * fout_h]
        his_emb = jnp.maximum(upto @ w.T, 0.0)

        cur_out = gnn(raw_full[:, day - 1:day][nodes_batch], cur_emb,
                      params["cur_gnn"][t], pos_full[:, day - 1:day])
        current.append(cur_out)
        upto_c = jnp.concatenate(current, axis=1)
        wc = params["cur_weight"][:, :t + 1]
        cur_emb = jnp.maximum(upto_c @ wc.T, 0.0)

    final = jnp.concatenate(historical + current, axis=1)
    return jnp.maximum(final @ params["final_weight"].T, 0.0)


# ---------------------------------------------------------------------------
# Demo
# ---------------------------------------------------------------------------

if __name__ == "__main__":
    key = jax.random.PRNGKey(0)

    tot_nodes = 20
    day = 5
    input_size = out_size = day          # features per node per timestamp
    num_timestamps = 3
    gnn_layers = 2
    st = 0

    k_adj, k_data, k_pos, k_param = jax.random.split(key, 4)

    # adjacency (dense, symmetric, self-loops), row-normalized mean aggregation
    a_raw = (jax.random.uniform(k_adj, (tot_nodes, tot_nodes)) < 0.3).astype(jnp.float32)
    a_sym = jnp.maximum(a_raw, a_raw.T) + jnp.eye(tot_nodes, dtype=jnp.float32)
    a_norm = a_sym / jnp.sum(a_sym, axis=1, keepdims=True)

    train_data = jax.random.normal(k_data, (st + num_timestamps, tot_nodes, day),
                                   dtype=jnp.float32)
    train_pos = 0.1 * jax.random.normal(k_pos, (st + num_timestamps, tot_nodes, day),
                                        dtype=jnp.float32)

    params = init_params(k_param, input_size, out_size, num_timestamps, gnn_layers)
    nodes_batch = jnp.arange(tot_nodes, dtype=jnp.int32)

    # one-time packing (per parameter update / adjacency change)
    packed = pack_combined_gnn(params, a_norm, day=day, out_size=out_size,
                               num_timestamps=num_timestamps,
                               gnn_layers=gnn_layers)

    out = combined_gnn_forward(packed, train_data, train_pos, nodes_batch,
                               st=st, day=day, out_size=out_size,
                               num_timestamps=num_timestamps,
                               gnn_layers=gnn_layers)
    out = jax.block_until_ready(out)

    expected_dim = num_timestamps * out_size
    assert out.shape == (tot_nodes, expected_dim), out.shape
    assert bool(jnp.all(jnp.isfinite(out)))

    ref = reference_forward(params, a_norm, train_data, train_pos, nodes_batch,
                            st, day, out_size, num_timestamps)
    max_err = float(jnp.max(jnp.abs(out - ref)))
    assert max_err < 7.5e-2, f"mismatch vs f32 reference: {max_err}"

    print("KERNEL_OK")
</pallas_src>

<mosaic_0001>
module attributes {stable_mosaic.version = 11 : i64} {
  func.func @_combined_gnn_kernel(%arg0: i32, %arg1: memref<128x128xbf16, #tpu.memory_space<any>>, %arg2: memref<1x128x128xbf16, #tpu.memory_space<vmem>>, %arg3: memref<1x128x128xbf16, #tpu.memory_space<vmem>>, %arg4: memref<1x256x128xbf16, #tpu.memory_space<vmem>>, %arg5: memref<1x1x128x128xbf16, #tpu.memory_space<vmem>>, %arg6: memref<1x128x256xbf16, #tpu.memory_space<vmem>>, %arg7: memref<128x128xf32, #tpu.memory_space<vmem>>, %arg8: memref<128x128xbf16, #tpu.memory_space<vmem>>, %arg9: memref<!tpu.dma_semaphore, #tpu.memory_space<semaphore_mem>>, %arg10: memref<128x128xf32, #tpu.memory_space<vmem>>) attributes {dimension_semantics = [#tpu.dimension_semantics<arbitrary>], iteration_bounds = array<i64: 3>, scalar_prefetch = 0 : i64, scratch_operands = 3 : i64, tpu.core_type = #tpu.core_type<tc>, window_params = [{}, {transform_indices = @transform_1, window_bounds = array<i64: 1, 128, 128>}, {transform_indices = @transform_2, window_bounds = array<i64: 1, 128, 128>}, {transform_indices = @transform_3, window_bounds = array<i64: 1, 256, 128>}, {transform_indices = @transform_4, window_bounds = array<i64: 1, 1, 128, 128>}, {transform_indices = @transform_5, window_bounds = array<i64: 1, 128, 256>}, {pipeline_mode = #tpu.pipeline_mode<synchronous>, transform_indices = @transform_6, window_bounds = array<i64: 128, 128>}]} {
    %c0_i32 = arith.constant 0 : i32
    %0 = arith.cmpi eq, %arg0, %c0_i32 : i32
    %1 = arith.extui %0 : i1 to i32
    %c0_i32_0 = arith.constant 0 : i32
    %2 = arith.cmpi ne, %1, %c0_i32_0 : i32
    scf.if %2 {
      tpu.enqueue_dma source(%arg1 : memref<128x128xbf16, #tpu.memory_space<any>>) target(%arg8 : memref<128x128xbf16, #tpu.memory_space<vmem>>) target_semaphore(%arg9 : memref<!tpu.dma_semaphore, #tpu.memory_space<semaphore_mem>>)
      tpu.wait_dma2 semaphore(%arg9 : memref<!tpu.dma_semaphore, #tpu.memory_space<semaphore_mem>>) src(%arg1 : memref<128x128xbf16, #tpu.memory_space<any>>) dst(%arg8 : memref<128x128xbf16, #tpu.memory_space<vmem>>)
      %cst_36 = arith.constant 0.000000e+00 : f32
      %45 = vector.broadcast %cst_36 : f32 to vector<128x128xf32>
      %c0_37 = arith.constant 0 : index
      %c0_38 = arith.constant 0 : index
      %46 = vector.load %arg10[%c0_37, %c0_38] : memref<128x128xf32, #tpu.memory_space<vmem>>, vector<128x128xf32>
      tpu.vector_store %arg10[%c0_37, %c0_38], %45 {strides = array<i32>} : memref<128x128xf32, #tpu.memory_space<vmem>>, vector<128x128xf32>,
      %cst_39 = arith.constant 0.000000e+00 : f32
      %47 = vector.broadcast %cst_39 : f32 to vector<128x128xf32>
      %c0_40 = arith.constant 0 : index
      %c0_41 = arith.constant 0 : index
      %48 = vector.load %arg7[%c0_40, %c0_41] : memref<128x128xf32, #tpu.memory_space<vmem>>, vector<128x128xf32>
      tpu.vector_store %arg7[%c0_40, %c0_41], %47 {strides = array<i32>} : memref<128x128xf32, #tpu.memory_space<vmem>>, vector<128x128xf32>,
    } else {
    }
    %c0 = arith.constant 0 : index
    %c0_1 = arith.constant 0 : index
    %3 = vector.load %arg8[%c0, %c0_1] : memref<128x128xbf16, #tpu.memory_space<vmem>>, vector<128x128xbf16>
    %c0_2 = arith.constant 0 : index
    %c0_3 = arith.constant 0 : index
    %4 = vector.load %arg10[%c0_2, %c0_3] : memref<128x128xf32, #tpu.memory_space<vmem>>, vector<128x128xf32>
    %cst = arith.constant 0.000000e+00 : f32
    %5 = vector.broadcast %cst : f32 to vector<128x128xf32>
    %6 = arith.maximumf %4, %5 : vector<128x128xf32>
    %7 = arith.truncf %6 : vector<128x128xf32> to vector<128x128xbf16>
    %c0_4 = arith.constant 0 : index
    %c0_5 = arith.constant 0 : index
    %c0_6 = arith.constant 0 : index
    %8 = vector.load %arg2[%c0_4, %c0_5, %c0_6] : memref<1x128x128xbf16, #tpu.memory_space<vmem>>, vector<1x128x128xbf16>
    %9 = vector.shape_cast %8 : vector<1x128x128xbf16> to vector<128x128xbf16>
    %10 = tpu.concatenate %9, %7 in 1 : vector<128x128xbf16>, vector<128x128xbf16> -> vector<128x256xbf16>
    %c0_7 = arith.constant 0 : index
    %c0_8 = arith.constant 0 : index
    %c0_9 = arith.constant 0 : index
    %11 = vector.load %arg4[%c0_7, %c0_8, %c0_9] : memref<1x256x128xbf16, #tpu.memory_space<vmem>>, vector<1x256x128xbf16>
    %12 = vector.shape_cast %11 : vector<1x256x128xbf16> to vector<256x128xbf16>
    %cst_10 = arith.constant dense<0.000000e+00> : vector<128x128xf32>
    %13 = tpu.matmul %10, %12, %cst_10 {dimension_numbers = #tpu.dot_dimension_numbers<[1], [0], [0], [1], [0, 0, 1, 1], [], []>} : vector<128x256xbf16>, vector<256x128xbf16>, vector<128x128xf32> -> vector<128x128xf32>
    %14 = arith.truncf %13 : vector<128x128xf32> to vector<128x128xbf16>
    %cst_11 = arith.constant dense<0.000000e+00> : vector<128x128xf32>
    %15 = tpu.matmul %3, %14, %cst_11 {dimension_numbers = #tpu.dot_dimension_numbers<[1], [0], [0], [1], [0, 0, 1, 1], [], []>} : vector<128x128xbf16>, vector<128x128xbf16>, vector<128x128xf32> -> vector<128x128xf32>
    %cst_12 = arith.constant 0.000000e+00 : f32
    %16 = vector.broadcast %cst_12 : f32 to vector<128x128xf32>
    %17 = arith.maximumf %15, %16 : vector<128x128xf32>
    %18 = arith.truncf %17 : vector<128x128xf32> to vector<128x128xbf16>
    %c0_13 = arith.constant 0 : index
    %c0_14 = arith.constant 0 : index
    %c0_15 = arith.constant 0 : index
    %c0_16 = arith.constant 0 : index
    %19 = vector.load %arg5[%c0_13, %c0_14, %c0_15, %c0_16] : memref<1x1x128x128xbf16, #tpu.memory_space<vmem>>, vector<1x1x128x128xbf16>
    %20 = vector.shape_cast %19 : vector<1x1x128x128xbf16> to vector<128x128xbf16>
    %cst_17 = arith.constant dense<0.000000e+00> : vector<128x128xf32>
    %21 = tpu.matmul %18, %20, %cst_17 {dimension_numbers = #tpu.dot_dimension_numbers<[1], [0], [0], [1], [0, 0, 1, 1], [], []>} : vector<128x128xbf16>, vector<128x128xbf16>, vector<128x128xf32> -> vector<128x128xf32>
    %22 = arith.truncf %21 : vector<128x128xf32> to vector<128x128xbf16>
    %cst_18 = arith.constant dense<0.000000e+00> : vector<128x128xf32>
    %23 = tpu.matmul %3, %22, %cst_18 {dimension_numbers = #tpu.dot_dimension_numbers<[1], [0], [0], [1], [0, 0, 1, 1], [], []>} : vector<128x128xbf16>, vector<128x128xbf16>, vector<128x128xf32> -> vector<128x128xf32>
    %cst_19 = arith.constant 0.000000e+00 : f32
    %24 = vector.broadcast %cst_19 : f32 to vector<128x128xf32>
    %25 = arith.maximumf %23, %24 : vector<128x128xf32>
    %c0_20 = arith.constant 0 : index
    %c0_21 = arith.constant 0 : index
    %c0_22 = arith.constant 0 : index
    %26 = vector.load %arg3[%c0_20, %c0_21, %c0_22] : memref<1x128x128xbf16, #tpu.memory_space<vmem>>, vector<1x128x128xbf16>
    %27 = vector.shape_cast %26 : vector<1x128x128xbf16> to vector<128x128xbf16>
    %28 = arith.extf %27 : vector<128x128xbf16> to vector<128x128xf32>
    %29 = arith.addf %25, %28 : vector<128x128xf32>
    %30 = arith.truncf %29 : vector<128x128xf32> to vector<128x128xbf16>
    %c0_23 = arith.constant 0 : index
    %c0_24 = arith.constant 0 : index
    %c0_25 = arith.constant 0 : index
    %31 = vector.load %arg6[%c0_23, %c0_24, %c0_25] : memref<1x128x256xbf16, #tpu.memory_space<vmem>>, vector<1x128x256xbf16>
    %32 = vector.shape_cast %31 : vector<1x128x256xbf16> to vector<128x256xbf16>
    %cst_26 = arith.constant dense<0.000000e+00> : vector<128x256xf32>
    %33 = tpu.matmul %30, %32, %cst_26 {dimension_numbers = #tpu.dot_dimension_numbers<[1], [0], [0], [1], [0, 0, 1, 1], [], []>} : vector<128x128xbf16>, vector<128x256xbf16>, vector<128x256xf32> -> vector<128x256xf32>
    %c0_27 = arith.constant 0 : index
    %c0_28 = arith.constant 0 : index
    %34 = vector.load %arg10[%c0_27, %c0_28] : memref<128x128xf32, #tpu.memory_space<vmem>>, vector<128x128xf32>
    %35 = vector.extract_strided_slice %33 {offsets = [0, 0], sizes = [128, 128], strides = [1, 1]} : vector<128x256xf32> to vector<128x128xf32>
    %36 = arith.addf %34, %35 : vector<128x128xf32>
    %c0_29 = arith.constant 0 : index
    %c0_30 = arith.constant 0 : index
    %37 = vector.load %arg10[%c0_29, %c0_30] : memref<128x128xf32, #tpu.memory_space<vmem>>, vector<128x128xf32>
    tpu.vector_store %arg10[%c0_29, %c0_30], %36 {strides = array<i32>} : memref<128x128xf32, #tpu.memory_space<vmem>>, vector<128x128xf32>,
    %c0_31 = arith.constant 0 : index
    %c0_32 = arith.constant 0 : index
    %38 = vector.load %arg7[%c0_31, %c0_32] : memref<128x128xf32, #tpu.memory_space<vmem>>, vector<128x128xf32>
    %39 = vector.extract_strided_slice %33 {offsets = [0, 128], sizes = [128, 128], strides = [1, 1]} : vector<128x256xf32> to vector<128x128xf32>
    %40 = arith.addf %38, %39 : vector<128x128xf32>
    %c0_33 = arith.constant 0 : index
    %c0_34 = arith.constant 0 : index
    %41 = vector.load %arg7[%c0_33, %c0_34] : memref<128x128xf32, #tpu.memory_space<vmem>>, vector<128x128xf32>
    tpu.vector_store %arg7[%c0_33, %c0_34], %40 {strides = array<i32>} : memref<128x128xf32, #tpu.memory_space<vmem>>, vector<128x128xf32>,
    %c2_i32 = arith.constant 2 : i32
    %42 = arith.cmpi eq, %arg0, %c2_i32 : i32
    %43 = arith.extui %42 : i1 to i32
    %c0_i32_35 = arith.constant 0 : i32
    %44 = arith.cmpi ne, %43, %c0_i32_35 : i32
    scf.if %44 {
      %c0_36 = arith.constant 0 : index
      %c0_37 = arith.constant 0 : index
      %45 = vector.load %arg7[%c0_36, %c0_37] : memref<128x128xf32, #tpu.memory_space<vmem>>, vector<128x128xf32>
      %cst_38 = arith.constant 0.000000e+00 : f32
      %46 = vector.broadcast %cst_38 : f32 to vector<128x128xf32>
      %47 = arith.maximumf %45, %46 : vector<128x128xf32>
      %c0_39 = arith.constant 0 : index
      %c0_40 = arith.constant 0 : index
      %48 = vector.load %arg7[%c0_39, %c0_40] : memref<128x128xf32, #tpu.memory_space<vmem>>, vector<128x128xf32>
      tpu.vector_store %arg7[%c0_39, %c0_40], %47 {strides = array<i32>} : memref<128x128xf32, #tpu.memory_space<vmem>>, vector<128x128xf32>,
    } else {
    }
    return
  }
  func.func @transform_1(%arg0: i32) -> (i32, i32, i32) {
    %c0_i32 = arith.constant 0 : i32
    %c0_i32_0 = arith.constant 0 : i32
    %c0_i32_1 = arith.constant 0 : i32
    return %arg0, %c0_i32, %c0_i32_0 : i32, i32, i32
  }
  func.func @transform_2(%arg0: i32) -> (i32, i32, i32) {
    %c0_i32 = arith.constant 0 : i32
    %c0_i32_0 = arith.constant 0 : i32
    %c0_i32_1 = arith.constant 0 : i32
    return %arg0, %c0_i32, %c0_i32_0 : i32, i32, i32
  }
  func.func @transform_3(%arg0: i32) -> (i32, i32, i32) {
    %c0_i32 = arith.constant 0 : i32
    %c0_i32_0 = arith.constant 0 : i32
    %c0_i32_1 = arith.constant 0 : i32
    return %arg0, %c0_i32, %c0_i32_0 : i32, i32, i32
  }
  func.func @transform_4(%arg0: i32) -> (i32, i32, i32, i32) {
    %c0_i32 = arith.constant 0 : i32
    %c0_i32_0 = arith.constant 0 : i32
    %c0_i32_1 = arith.constant 0 : i32
    %c0_i32_2 = arith.constant 0 : i32
    return %arg0, %c0_i32, %c0_i32_0, %c0_i32_1 : i32, i32, i32, i32
  }
  func.func @transform_5(%arg0: i32) -> (i32, i32, i32) {
    %c0_i32 = arith.constant 0 : i32
    %c0_i32_0 = arith.constant 0 : i32
    %c0_i32_1 = arith.constant 0 : i32
    return %arg0, %c0_i32, %c0_i32_0 : i32, i32, i32
  }
  func.func @transform_6(%arg0: i32) -> (i32, i32) {
    %c0_i32 = arith.constant 0 : i32
    %c0_i32_0 = arith.constant 0 : i32
    %c0_i32_1 = arith.constant 0 : i32
    return %c0_i32, %c0_i32_0 : i32, i32
  }
}

</mosaic_0001>

<bundles_post_ra>
// kernel: combined_gnn_forward.1
= control target key start
LH: loop header
LB: loop body
LE: loop exit
PB: predicated region body
PF: predicated region fallthrough
CT: control target
= control target key end

     0   :  { %s2144_s21 = smov 0   ;;  %s2610_s0 = inlined_call_operand.vmem [shape: bf16[128,128], index: 0, kind: input, shape index: {}]   ;;  %s2611_s1 = inlined_call_operand.vmem [shape: bf16[3,128,128], index: 1, kind: input, shape index: {}]   ;;  %s2612_s2 = inlined_call_operand.vmem [shape: bf16[3,128,128], index: 2, kind: input, shape index: {}]   ;;  %s2613_s3 = inlined_call_operand.vmem [shape: bf16[3,256,128], index: 3, kind: input, shape index: {}]   ;;  %s2614_s4 = inlined_call_operand.vmem [shape: bf16[3,1,128,128], index: 4, kind: input, shape index: {}]   ;;  %s2615_s5 = inlined_call_operand.vmem [shape: bf16[3,128,256], index: 5, kind: input, shape index: {}]   ;;  %s2616_s6 = inlined_call_operand.vmem [shape: f32[128,128], index: 6, kind: output, shape index: {}]  }
   0x1 LB: > { %s2150_s22 = sadd.s32 4294967295, %s2105_s21   ;;  %p1683_p0 = scmp.ge.s32.totalorder %s2105_s21, 1  ;;  %s2105_s21 = sphi %s2144_s21, %s16_s21  }
   0x2   : > { %p223_p1 = scmp.lt.s32.totalorder %s2105_s21, 4 }
   0x4   : > { %p224_p2 = pnand %p1683_p0, %p223_p1 }
   0x5   : > { %p266_p3 = scmp.lt.s32.totalorder (!%p224_p2), %s2150_s22, 2  ;;  %p1694_p4 = scmp.ne.s32.totalorder (!%p224_p2), %s2150_s22, 0 }
   0x6   : > { %227 = sbr.rel (%p224_p2) target bundleno = 1290 (0x50a), region = 40 }
   0xb   : > { %s267_s23 = scalar_select %p266_p3, %s2150_s22, 2 }
   0xc   : > { %295 = sbr.rel (%p1694_p4) target bundleno = 41 (0x29), region = 44 }
   0xd   : > { %s1755_s24 = sshll.u32 %s267_s23, 6  ;;  %s1757_s25 = sshll.u32 %s267_s23, 7 }
   0xe   : > { %s2159_s28 = scalar_lea.vmem %s2611_s1, %s1755_s24  ;;  %s2164_s7 = scalar_lea.vmem %s2612_s2, %s1755_s24 }
   0xf   : > { %s2169_s10 = scalar_lea.vmem %s2613_s3, %s1757_s25  ;;  %s2174_s13 = scalar_lea.vmem %s2614_s4, %s1755_s24 }
  0x10   : > { %s2179_s16 = scalar_lea.vmem %s2615_s5, %s1757_s25 }
  0x11   : > { %v329_v0 = vld [vmem:[%s2610_s0] sm:$0xff]  ;;  %v331_v1 = vld [vmem:[%s2610_s0 + $0x8] sm:$0xff]  ;;  %v333_v2 = vld [vmem:[%s2610_s0 + $0x10] sm:$0xff] }
  0x12   : > { %330 = vst [vmem:[#allocation2] sm:$0xff] %v329_v0  ;;  %332 = vst [vmem:[#allocation2 + $0x8] sm:$0xff] %v331_v1  ;;  %v335_v3 = vld [vmem:[%s2610_s0 + $0x18] sm:$0xff]  ;;  %v337_v4 = vld [vmem:[%s2610_s0 + $0x20] sm:$0xff] }
  0x13   : > { %334 = vst [vmem:[#allocation2 + $0x10] sm:$0xff] %v333_v2  ;;  %v339_v5 = vld [vmem:[%s2610_s0 + $0x28] sm:$0xff]  ;;  %336 = vst [vmem:[#allocation2 + $0x18] sm:$0xff] %v335_v3  ;;  %v341_v6 = vld [vmem:[%s2610_s0 + $0x30] sm:$0xff] }
  0x14   : > { %338 = vst [vmem:[#allocation2 + $0x20] sm:$0xff] %v337_v4  ;;  %340 = vst [vmem:[#allocation2 + $0x28] sm:$0xff] %v339_v5  ;;  %v343_v7 = vld [vmem:[%s2610_s0 + $0x38] sm:$0xff] }
  0x15   : > { %342 = vst [vmem:[#allocation2 + $0x30] sm:$0xff] %v341_v6  ;;  %344 = vst [vmem:[#allocation2 + $0x38] sm:$0xff] %v343_v7 }
  0x16   : > { %352 = vsyncadd [#allocation3], 1024 }
  0x17   : > { %2101 = dma.done.wait [#allocation3], 1024 }
  0x18   : > { %2102 = vsyncadd [#allocation3], 4294966272  ;;  %v2107_v8 = vmov 0.0  }
  0x19   : > { %357 = vst [vmem:[#allocation4 + $0x30] sm:$0xff] %v2107_v8  ;;  %358 = vst [vmem:[#allocation4] sm:$0xff] %v2107_v8 }
  0x1a   : > { %359 = vst [vmem:[#allocation4 + $0x58] sm:$0xff] %v2107_v8  ;;  %360 = vst [vmem:[#allocation4 + $0x18] sm:$0xff] %v2107_v8 }
  0x1b   : > { %361 = vst [vmem:[#allocation4 + $0x50] sm:$0xff] %v2107_v8  ;;  %362 = vst [vmem:[#allocation4 + $0x68] sm:$0xff] %v2107_v8 }
  0x1c   : > { %363 = vst [vmem:[#allocation4 + $0x8] sm:$0xff] %v2107_v8  ;;  %364 = vst [vmem:[#allocation4 + $0x48] sm:$0xff] %v2107_v8 }
  0x1d   : > { %365 = vst [vmem:[#allocation4 + $0x40] sm:$0xff] %v2107_v8  ;;  %366 = vst [vmem:[#allocation4 + $0x20] sm:$0xff] %v2107_v8 }
  0x1e   : > { %367 = vst [vmem:[#allocation4 + $0x10] sm:$0xff] %v2107_v8  ;;  %368 = vst [vmem:[#allocation4 + $0x38] sm:$0xff] %v2107_v8 }
  0x1f   : > { %369 = vst [vmem:[#allocation4 + $0x60] sm:$0xff] %v2107_v8  ;;  %370 = vst [vmem:[#allocation4 + $0x70] sm:$0xff] %v2107_v8 }
  0x20   : > { %371 = vst [vmem:[#allocation4 + $0x78] sm:$0xff] %v2107_v8  ;;  %372 = vst [vmem:[#allocation4 + $0x28] sm:$0xff] %v2107_v8 }
  0x21   : > { %373 = vst [vmem:[%s2616_s6] sm:$0xff] %v2107_v8  ;;  %374 = vst [vmem:[%s2616_s6 + $0x8] sm:$0xff] %v2107_v8 }
  0x22   : > { %375 = vst [vmem:[%s2616_s6 + $0x10] sm:$0xff] %v2107_v8  ;;  %376 = vst [vmem:[%s2616_s6 + $0x18] sm:$0xff] %v2107_v8 }
  0x23   : > { %377 = vst [vmem:[%s2616_s6 + $0x20] sm:$0xff] %v2107_v8  ;;  %378 = vst [vmem:[%s2616_s6 + $0x28] sm:$0xff] %v2107_v8 }
  0x24   : > { %379 = vst [vmem:[%s2616_s6 + $0x30] sm:$0xff] %v2107_v8  ;;  %380 = vst [vmem:[%s2616_s6 + $0x38] sm:$0xff] %v2107_v8 }
  0x25   : > { %381 = vst [vmem:[%s2616_s6 + $0x40] sm:$0xff] %v2107_v8  ;;  %382 = vst [vmem:[%s2616_s6 + $0x48] sm:$0xff] %v2107_v8 }
  0x26   : > { %383 = vst [vmem:[%s2616_s6 + $0x50] sm:$0xff] %v2107_v8  ;;  %384 = vst [vmem:[%s2616_s6 + $0x58] sm:$0xff] %v2107_v8 }
  0x27   : > { %385 = vst [vmem:[%s2616_s6 + $0x60] sm:$0xff] %v2107_v8  ;;  %386 = vst [vmem:[%s2616_s6 + $0x68] sm:$0xff] %v2107_v8 }
  0x28   : > { %387 = vst [vmem:[%s2616_s6 + $0x70] sm:$0xff] %v2107_v8  ;;  %388 = vst [vmem:[%s2616_s6 + $0x78] sm:$0xff] %v2107_v8 }
  0x29 PF: > { %v2033_v9 = vld [vmem:[%s2169_s10 + $0x78] sm:$0xff]   ;;  %v2035_v11 = vld [vmem:[%s2169_s10 + $0x70] sm:$0xff]   ;;  %v2037_v13 = vld [vmem:[%s2169_s10 + $0x68] sm:$0xff]   ;;  %p1751_p5 = scmp.ne.s32.totalorder %s2150_s22, 2 }
  0x2a   : > { %v2034_v10 = vld [vmem:[%s2169_s10 + $0x38] sm:$0xff]   ;;  %1799 = vmatprep.subr.bf16.mxu0 %v2033_v9  ;;  %v2036_v12 = vld [vmem:[%s2169_s10 + $0x30] sm:$0xff]   ;;  %v2038_v14 = vld [vmem:[%s2169_s10 + $0x28] sm:$0xff]  }
  0x2b   : > { %1800 = vmatpush3.bf16.msra.mxu0 %v2034_v10  ;;  %v2039_v15 = vld [vmem:[%s2169_s10 + $0x60] sm:$0xff]   ;;  %v2041_v17 = vld [vmem:[%s2169_s10 + $0x58] sm:$0xff]   ;;  %v2043_v19 = vld [vmem:[%s2169_s10 + $0x50] sm:$0xff]  }
  0x2c   : > { %1801 = vmatprep.subr.bf16.mxu0 %v2035_v11  ;;  %v2040_v16 = vld [vmem:[%s2169_s10 + $0x20] sm:$0xff]   ;;  %v2042_v18 = vld [vmem:[%s2169_s10 + $0x18] sm:$0xff]   ;;  %v2265_v20 = vld [vmem:[#allocation4 + $0x30] sm:$0xff] }
  0x2d   : > { %v2267_v21 = vld [vmem:[#allocation4] sm:$0xff]  ;;  %v421_v22 = vmax.f32 %v2265_v20, 0.0  ;;  %v2044_v24 = vld [vmem:[%s2169_s10 + $0x10] sm:$0xff]   ;;  %v2045_v26 = vld [vmem:[%s2169_s10 + $0x48] sm:$0xff]  }
  0x2e   : > { %v422_v23 = vmax.f32 %v2267_v21, 0.0  ;;  %v2046_v27 = vld [vmem:[%s2169_s10 + $0x8] sm:$0xff]   ;;  %v2047_v28 = vld [vmem:[%s2169_s10 + $0x40] sm:$0xff]   ;;  %v2275_v29 = vld [vmem:[#allocation4 + $0x58] sm:$0xff] }
  0x2f   : > { %1802 = vmatpush3.bf16.msra.mxu0 %v2036_v12  ;;  %v2277_v30 = vld [vmem:[#allocation4 + $0x18] sm:$0xff]  ;;  %v2048_v31 = vld [vmem:[%s2169_s10] sm:$0xff]   ;;  %v423_v32 = vmax.f32 %v2275_v29, 0.0  ;;  %v2282_v34 = vld [vmem:[#allocation4 + $0x50] sm:$0xff] }
  0x30   : > { %1803 = vmatprep.subr.bf16.mxu0 %v2037_v13  ;;  %v437_v25 = vpack.c.bf16 %v422_v23, %v421_v22  ;;  %v424_v33 = vmax.f32 %v2277_v30, 0.0  ;;  %v2284_v35 = vld [vmem:[#allocation4 + $0x68] sm:$0xff]  ;;  %v2049_v36 = vld [vmem:[%s2159_s28] sm:$0xff]   ;;  %v425_v38 = vmax.f32 %v2282_v34, 0.0  ;;  %v2051_v46 = vld [vmem:[%s2159_s28 + $0x10] sm:$0xff]  }
  0x31   : > { %v426_v39 = vmax.f32 %v2284_v35, 0.0  ;;  %v2050_v40 = vld [vmem:[%s2159_s28 + $0x8] sm:$0xff]   ;;  %v2297_v48 = vld [vmem:[#allocation4 + $0x40] sm:$0xff]  ;;  %v2052_v52 = vld [vmem:[%s2159_s28 + $0x18] sm:$0xff]  }
  0x32   : > { %669 = vmatprep.mubr.bf16.mxu0 %v437_v25  ;;  %v438_v37 = vpack.c.bf16 %v424_v33, %v423_v32  ;;  %v2290_v41 = vld [vmem:[#allocation4 + $0x8] sm:$0xff]  ;;  %v2299_v49 = vld [vmem:[#allocation4 + $0x20] sm:$0xff]  ;;  %v429_v50 = vmax.f32 %v2297_v48, 0.0  ;;  %v2304_v54 = vld [vmem:[#allocation4 + $0x10] sm:$0xff] }
  0x33   : > { %1804 = vmatpush3.bf16.msra.mxu0 %v2038_v14  ;;  %v2292_v42 = vld [vmem:[#allocation4 + $0x48] sm:$0xff]  ;;  %v439_v43 = vpack.c.bf16 %v426_v39, %v425_v38  ;;  %v427_v44 = vmax.f32 %v2290_v41, 0.0  ;;  %v430_v51 = vmax.f32 %v2299_v49, 0.0  ;;  %v2306_v55 = vld [vmem:[#allocation4 + $0x38] sm:$0xff]  ;;  %v431_v56 = vmax.f32 %v2304_v54, 0.0  ;;  %v2053_v58 = vld [vmem:[%s2159_s28 + $0x20] sm:$0xff]  }
  0x34   : > { %1805 = vmatprep.subr.bf16.mxu0 %v2039_v15  ;;  %v428_v45 = vmax.f32 %v2292_v42, 0.0  ;;  %v432_v57 = vmax.f32 %v2306_v55, 0.0  ;;  %v2311_v60 = vld [vmem:[#allocation4 + $0x60] sm:$0xff]  ;;  %v2313_v61 = vld [vmem:[#allocation4 + $0x70] sm:$0xff]  ;;  %v2054_v0 = vld [vmem:[%s2159_s28 + $0x28] sm:$0xff]  }
  0x35   : > { %v441_v53 = vpack.c.bf16 %v430_v51, %v429_v50  ;;  %v433_v62 = vmax.f32 %v2311_v60, 0.0  ;;  %v434_v63 = vmax.f32 %v2313_v61, 0.0  ;;  %v2318_v2 = vld [vmem:[#allocation4 + $0x78] sm:$0xff]  ;;  %v2320_v3 = vld [vmem:[#allocation4 + $0x28] sm:$0xff]  ;;  %v2055_v6 = vld [vmem:[%s2159_s28 + $0x30] sm:$0xff]  }
  0x36   : > { %v440_v47 = vpack.c.bf16 %v428_v45, %v427_v44  ;;  %v442_v59 = vpack.c.bf16 %v432_v57, %v431_v56  ;;  %v435_v4 = vmax.f32 %v2318_v2, 0.0  ;;  %v436_v5 = vmax.f32 %v2320_v3, 0.0  ;;  %v2056_v8 = vld [vmem:[%s2159_s28 + $0x38] sm:$0xff]   ;;  %v2057_v9 = vld [vmem:[#allocation2] sm:$0xff]  }
  0x37   : > { %1806 = vmatpush3.bf16.msra.mxu0 %v2040_v16  ;;  %v443_v1 = vpack.c.bf16 %v434_v63, %v433_v62  ;;  %1927 = vmatprep.mubr.bf16.mxu1 %v2057_v9 }
  0x38   : > { %1807 = vmatprep.subr.bf16.mxu0 %v2041_v17  ;;  %v444_v7 = vpack.c.bf16 %v436_v5, %v435_v4 }
  0x3b   : > { %1808 = vmatpush3.bf16.msra.mxu0 %v2042_v18 }
  0x3c   : > { %1809 = vmatprep.subr.bf16.mxu0 %v2043_v19 }
  0x3f   : > { %1810 = vmatpush3.bf16.msra.mxu0 %v2044_v24 }
  0x40   : > { %1811 = vmatprep.subr.bf16.mxu0 %v2045_v26 }
  0x43   : > { %1812 = vmatpush3.bf16.msra.mxu0 %v2046_v27 }
  0x44   : > { %1813 = vmatprep.subr.bf16.mxu0 %v2047_v28 }
  0x47   : > { %1814 = vmatpush3.bf16.msra.mxu0 %v2048_v31 }
  0x4a   : > { %670 = vmatmul.mubr.bf16.vlgmr.msra.gmra.mxu0 %v2049_v36 }
  0x4b   : > { %677 = vmatprep.mubr.bf16.mxu0 %v438_v37 }
  0x52   : > { %678 = vmatmul.mubr.bf16.gmra.mxu0 %v2050_v40 }
  0x53   : > { %685 = vmatprep.mubr.bf16.mxu0 %v439_v43 }
  0x5a   : > { %686 = vmatmul.mubr.bf16.gmra.mxu0 %v2051_v46 }
  0x5b   : > { %693 = vmatprep.mubr.bf16.mxu0 %v440_v47 }
  0x62   : > { %694 = vmatmul.mubr.bf16.gmra.mxu0 %v2052_v52 }
  0x63   : > { %701 = vmatprep.mubr.bf16.mxu0 %v441_v53 }
  0x6a   : > { %702 = vmatmul.mubr.bf16.gmra.mxu0 %v2053_v58 }
  0x6b   : > { %709 = vmatprep.mubr.bf16.mxu0 %v442_v59 }
  0x72   : > { %710 = vmatmul.mubr.bf16.gmra.mxu0 %v2054_v0 }
  0x73   : > { %717 = vmatprep.mubr.bf16.mxu0 %v443_v1 }
  0x7a   : > { %718 = vmatmul.mubr.bf16.gmra.mxu0 %v2055_v6 }
  0x7b   : > { %725 = vmatprep.mubr.bf16.mxu0 %v444_v7 }
  0x82   : > { %726 = vmatmul.mubr.bf16.gmra.mxu0 %v2056_v8 }
  0x83   : > { %1991 = vmatprep.mubr.bf16.mxu0 %v2057_v9 }
 0x10a   : > { %v1815_v10 = vpop.f32.mrf.mxu0 }
 0x10c   : > { %v1816_v11 = vpop.f32.mrf.mxu0 }
 0x10d   : > { %v1817_v12 = vadd.f32 %v1816_v11, %v1815_v10 }
 0x10e   : > { %v1818_v13 = vpop.f32.mrf.mxu0 }
 0x110   : > { %v1819_v14 = vpop.f32.mrf.mxu0 }
 0x111   : > { %v1820_v15 = vadd.f32 %v1819_v14, %v1818_v13 }
 0x112   : > { %v1821_v16 = vpop.f32.mrf.mxu0 }
 0x113   : > { %v2326_v17 = vpack.c.bf16 %v1820_v15, %v1817_v12 }
 0x114   : > { %v1822_v18 = vpop.f32.mrf.mxu0 }
 0x115   : > { %v1823_v19 = vadd.f32 %v1822_v18, %v1821_v16 }
 0x116   : > { %v1824_v22 = vpop.f32.mrf.mxu0 }
 0x118   : > { %v1825_v23 = vpop.f32.mrf.mxu0 }
 0x119   : > { %v1826_v24 = vadd.f32 %v1825_v23, %v1824_v22  ;;  %v2330_v22 = vld [vmem:[#allocation2 + $0x8] sm:$0xff]   ;;  %v2333_v23 = vld [vmem:[#allocation2 + $0x10] sm:$0xff]  }
 0x11a   : > { %v1827_v25 = vpop.f32.mrf.mxu0 }
 0x11b   : > { %v735_v26 = vpack.c.bf16 %v1826_v24, %v1823_v19  ;;  %v2065_v19 = vld [vmem:[%s2174_s13 + $0x38] sm:$0xff]   ;;  %v2066_v24 = vld [vmem:[%s2174_s13 + $0x30] sm:$0xff]  }
 0x11c   : > { %v1828_v27 = vpop.f32.mrf.mxu0 }
 0x11d   : > { %v1829_v16 = vadd.f32 %v1828_v27, %v1827_v25  ;;  %v2067_v25 = vld [vmem:[%s2174_s13 + $0x28] sm:$0xff]   ;;  %v2341_v27 = vld [vmem:[#allocation2 + $0x20] sm:$0xff]  }
 0x11e   : > { %v1830_v28 = vpop.f32.mrf.mxu0 }
 0x120   : > { %v1831_v31 = vpop.f32.mrf.mxu0 }
 0x121   : > { %v1832_v14 = vadd.f32 %v1831_v31, %v1830_v28  ;;  %v2069_v28 = vld [vmem:[%s2174_s13 + $0x18] sm:$0xff]   ;;  %v2347_v31 = vld [vmem:[#allocation2 + $0x28] sm:$0xff]  }
 0x122   : > { %v1833_v32 = vpop.f32.mrf.mxu0 }
 0x123   : > { %v736_v18 = vpack.c.bf16 %v1832_v14, %v1829_v16 }
 0x124   : > { %v1834_v33 = vpop.f32.mrf.mxu0 }
 0x125   : > { %v1835_v13 = vadd.f32 %v1834_v33, %v1833_v32  ;;  %v2349_v32 = vld [vmem:[#allocation2 + $0x30] sm:$0xff]   ;;  %v2353_v33 = vld [vmem:[#allocation2 + $0x38] sm:$0xff]  }
 0x126   : > { %v1836_v36 = vpop.f32.mrf.mxu0 }
 0x128   : > { %v1837_v37 = vpop.f32.mrf.mxu0 }
 0x129   : > { %v1838_v11 = vadd.f32 %v1837_v37, %v1836_v36  ;;  %v2070_v36 = vld [vmem:[%s2174_s13 + $0x10] sm:$0xff]   ;;  %v2071_v37 = vld [vmem:[%s2174_s13 + $0x8] sm:$0xff]  }
 0x12a   : > { %v1839_v38 = vpop.f32.mrf.mxu0 }
 0x12b   : > { %v737_v15 = vpack.c.bf16 %v1838_v11, %v1835_v13 }
 0x12c   : > { %v1840_v39 = vpop.f32.mrf.mxu0 }
 0x12d   : > { %v1841_v10 = vadd.f32 %v1840_v39, %v1839_v38  ;;  %v2072_v38 = vld [vmem:[%s2174_s13] sm:$0xff]  }
 0x12e   : > { %v1842_v40 = vpop.f32.mrf.mxu0 }
 0x130   : > { %v1843_v43 = vpop.f32.mrf.mxu0 }
 0x131   : > { %v1844_v8 = vadd.f32 %v1843_v43, %v1842_v40 }
 0x132   : > { %v1845_v44 = vpop.f32.mrf.mxu0 }
 0x133   : > { %v738_v12 = vpack.c.bf16 %v1844_v8, %v1841_v10 }
 0x134   : > { %v1846_v45 = vpop.f32.mrf.mxu0 }
 0x135   : > { %v1847_v7 = vadd.f32 %v1846_v45, %v1845_v44 }
 0x136   : > { %v1848_v46 = vpop.f32.mrf.mxu0 }
 0x138   : > { %v1849_v47 = vpop.f32.mrf.mxu0 }
 0x139   : > { %v1850_v5 = vadd.f32 %v1849_v47, %v1848_v46 }
 0x13a   : > { %v1851_v50 = vpop.f32.mrf.mxu0 }
 0x13b   : > { %v739_v9 = vpack.c.bf16 %v1850_v5, %v1847_v7 }
 0x13c   : > { %v1852_v51 = vpop.f32.mrf.mxu0 }
 0x13d   : > { %v1853_v1 = vadd.f32 %v1852_v51, %v1851_v50 }
 0x13e   : > { %v1854_v52 = vpop.f32.mrf.mxu0 }
 0x140   : > { %v1855_v53 = vpop.f32.mrf.mxu0 }
 0x141   : > { %v1856_v62 = vadd.f32 %v1855_v53, %v1854_v52 }
 0x142   : > { %v1857_v56 = vpop.f32.mrf.mxu0 }
 0x143   : > { %v740_v6 = vpack.c.bf16 %v1856_v62, %v1853_v1 }
 0x144   : > { %v1858_v57 = vpop.f32.mrf.mxu0 }
 0x145   : > { %v1859_v63 = vadd.f32 %v1858_v57, %v1857_v56 }
 0x146   : > { %v1860_v58 = vpop.f32.mrf.mxu0 }
 0x148   : > { %v1861_v59 = vpop.f32.mrf.mxu0 }
 0x149   : > { %v1862_v0 = vadd.f32 %v1861_v59, %v1860_v58 }
 0x14b   : > { %v741_v4 = vpack.c.bf16 %v1862_v0, %v1859_v63 }
 0x14d   : > { %1911 = vmatprep.subr.bf16.mxu1 %v741_v4 }
 0x14e   : > { %1912 = vmatpush3.bf16.msra.mxu1 %v741_v4 }
 0x14f   : > { %1913 = vmatprep.subr.bf16.mxu1 %v740_v6 }
 0x152   : > { %1914 = vmatpush3.bf16.msra.mxu1 %v740_v6 }
 0x153   : > { %1915 = vmatprep.subr.bf16.mxu1 %v739_v9 }
 0x156   : > { %1916 = vmatpush3.bf16.msra.mxu1 %v739_v9 }
 0x157   : > { %1917 = vmatprep.subr.bf16.mxu1 %v738_v12 }
 0x15a   : > { %1918 = vmatpush3.bf16.msra.mxu1 %v738_v12 }
 0x15b   : > { %1919 = vmatprep.subr.bf16.mxu1 %v737_v15 }
 0x15e   : > { %1920 = vmatpush3.bf16.msra.mxu1 %v737_v15 }
 0x15f   : > { %1921 = vmatprep.subr.bf16.mxu1 %v736_v18 }
 0x162   : > { %1922 = vmatpush3.bf16.msra.mxu1 %v736_v18 }
 0x163   : > { %1923 = vmatprep.subr.bf16.mxu1 %v735_v26 }
 0x166   : > { %1924 = vmatpush3.bf16.msra.mxu1 %v735_v26  ;;  %v2339_v26 = vld [vmem:[#allocation2 + $0x18] sm:$0xff]  }
 0x167   : > { %1925 = vmatprep.subr.bf16.mxu1 %v2326_v17 }
 0x16a   : > { %1926 = vmatpush3.bf16.msra.mxu1 %v2326_v17  ;;  %v2068_v17 = vld [vmem:[%s2174_s13 + $0x20] sm:$0xff]  }
 0x16b   : > { %1943 = vmatprep.subr.bf16.mxu1 %v2065_v19 }
 0x16d   : > { %1928 = vmatmul.mubr.bf16.vlgmr.msra.gmra.mxu1 %v2330_v22 }
 0x16e   : > { %1931 = vmatprep.mubr.bf16.mxu1 %v2333_v23  ;;  %1944 = vmatpush3.bf16.msra.mxu1 %v2065_v19 }
 0x16f   : > { %1945 = vmatprep.subr.bf16.mxu1 %v2066_v24 }
 0x172   : > { %1946 = vmatpush3.bf16.msra.mxu1 %v2066_v24 }
 0x173   : > { %1947 = vmatprep.subr.bf16.mxu1 %v2067_v25 }
 0x175   : > { %1932 = vmatmul.mubr.bf16.gmra.mxu1 %v2339_v26 }
 0x176   : > { %1935 = vmatprep.mubr.bf16.mxu1 %v2341_v27  ;;  %1948 = vmatpush3.bf16.msra.mxu1 %v2067_v25 }
 0x177   : > { %1949 = vmatprep.subr.bf16.mxu1 %v2068_v17 }
 0x17a   : > { %1950 = vmatpush3.bf16.msra.mxu1 %v2068_v17 }
 0x17b   : > { %1951 = vmatprep.subr.bf16.mxu1 %v2069_v28 }
 0x17d   : > { %1936 = vmatmul.mubr.bf16.gmra.mxu1 %v2347_v31 }
 0x17e   : > { %1939 = vmatprep.mubr.bf16.mxu1 %v2349_v32  ;;  %1952 = vmatpush3.bf16.msra.mxu1 %v2069_v28 }
 0x17f   : > { %1953 = vmatprep.subr.bf16.mxu1 %v2070_v36 }
 0x182   : > { %1954 = vmatpush3.bf16.msra.mxu1 %v2070_v36 }
 0x183   : > { %1955 = vmatprep.subr.bf16.mxu1 %v2071_v37 }
 0x185   : > { %1940 = vmatmul.mubr.bf16.gmra.mxu1 %v2353_v33 }
 0x186   : > { %1956 = vmatpush3.bf16.msra.mxu1 %v2071_v37 }
 0x187   : > { %1957 = vmatprep.subr.bf16.mxu1 %v2072_v38 }
 0x18a   : > { %1958 = vmatpush3.bf16.msra.mxu1 %v2072_v38  ;;  %v2075_v38 = vld [vmem:[%s2179_s16 + $0x74] ss:$8 sps:$4 sm:$0xff]  }
 0x18b   : > { %2007 = vmatprep.subr.bf16.mxu1 %v2075_v38 }
 0x22d   : > { %v1929_v39 = vpop.f32.mrf.mxu1 }
 0x22e   : > { %v889_v50 = vmax.f32 %v1929_v39, 0.0  ;;  %v2073_v39 = vld [vmem:[%s2179_s16 + $0x70] ss:$8 sps:$4 sm:$0xff]  }
 0x22f   : > { %v824_v40 = vpop.f32.mrf.mxu1 }
 0x230   : > { %v887_v46 = vmax.f32 %v824_v40, 0.0  ;;  %v2078_v40 = vld [vmem:[%s2179_s16 + $0x64] ss:$8 sps:$4 sm:$0xff]  }
 0x231   : > { %v1930_v43 = vpop.f32.mrf.mxu1 }
 0x232   : > { %v890_v44 = vmax.f32 %v1930_v43, 0.0  ;;  %v2076_v43 = vld [vmem:[%s2179_s16 + $0x60] ss:$8 sps:$4 sm:$0xff]  }
 0x233   : > { %v827_v45 = vpop.f32.mrf.mxu1 }
 0x234   : > { %v888_v47 = vmax.f32 %v827_v45, 0.0  ;;  %v904_v53 = vpack.c.bf16 %v890_v44, %v889_v50  ;;  %v2081_v44 = vld [vmem:[%s2179_s16 + $0x54] ss:$8 sps:$4 sm:$0xff]   ;;  %v2079_v45 = vld [vmem:[%s2179_s16 + $0x50] ss:$8 sps:$4 sm:$0xff]  }
 0x235   : > { %v1933_v51 = vpop.f32.mrf.mxu1  ;;  %v2087_v50 = vld [vmem:[%s2179_s16 + $0x34] ss:$8 sps:$4 sm:$0xff]  }
 0x236   : > { %v903_v52 = vpack.c.bf16 %v888_v47, %v887_v46  ;;  %v893_v0 = vmax.f32 %v1933_v51, 0.0  ;;  %v2084_v46 = vld [vmem:[%s2179_s16 + $0x44] ss:$8 sps:$4 sm:$0xff]   ;;  %v2082_v47 = vld [vmem:[%s2179_s16 + $0x40] ss:$8 sps:$4 sm:$0xff]  }
 0x237   : > { %v840_v56 = vpop.f32.mrf.mxu1  ;;  %v2085_v51 = vld [vmem:[%s2179_s16 + $0x30] ss:$8 sps:$4 sm:$0xff]  }
 0x238   : > { %1959 = vmatprep.mubr.bf16.mxu1 %v903_v52  ;;  %v891_v62 = vmax.f32 %v840_v56, 0.0 }
 0x239   : > { %v1934_v57 = vpop.f32.mrf.mxu1  ;;  %1960 = vmatmul.mubr.bf16.vlgmr.msra.gmra.mxu1 %v904_v53 }
 0x23a   : > { %v894_v58 = vmax.f32 %v1934_v57, 0.0  ;;  %2015 = vmatpush1.bf16.msra.mxu1 %v2073_v39 }
 0x23b   : > { %v843_v59 = vpop.f32.mrf.mxu1  ;;  %2008 = vmatprep.subr.bf16.mxu1 %v2078_v40 }
 0x23c   : > { %v892_v63 = vmax.f32 %v843_v59, 0.0  ;;  %v906_v5 = vpack.c.bf16 %v894_v58, %v893_v0 }
 0x23d   : > { %v1937_v1 = vpop.f32.mrf.mxu1 }
 0x23e   : > { %v905_v4 = vpack.c.bf16 %v892_v63, %v891_v62  ;;  %v897_v12 = vmax.f32 %v1937_v1, 0.0  ;;  %2016 = vmatpush1.bf16.msra.mxu1 %v2076_v43 }
 0x23f   : > { %v856_v6 = vpop.f32.mrf.mxu1  ;;  %2009 = vmatprep.subr.bf16.mxu1 %v2081_v44 }
 0x240   : > { %1963 = vmatprep.mubr.bf16.mxu1 %v905_v4  ;;  %v895_v10 = vmax.f32 %v856_v6, 0.0 }
 0x241   : > { %v1938_v7 = vpop.f32.mrf.mxu1  ;;  %1964 = vmatmul.mubr.bf16.gmra.mxu1 %v906_v5 }
 0x242   : > { %v898_v8 = vmax.f32 %v1938_v7, 0.0  ;;  %2017 = vmatpush1.bf16.msra.mxu1 %v2079_v45 }
 0x243   : > { %v859_v9 = vpop.f32.mrf.mxu1  ;;  %2010 = vmatprep.subr.bf16.mxu1 %v2084_v46 }
 0x244   : > { %v896_v11 = vmax.f32 %v859_v9, 0.0  ;;  %v908_v15 = vpack.c.bf16 %v898_v8, %v897_v12 }
 0x245   : > { %v1941_v13 = vpop.f32.mrf.mxu1 }
 0x246   : > { %v907_v14 = vpack.c.bf16 %v896_v11, %v895_v10  ;;  %v901_v28 = vmax.f32 %v1941_v13, 0.0  ;;  %2018 = vmatpush1.bf16.msra.mxu1 %v2082_v47 }
 0x247   : > { %v872_v16 = vpop.f32.mrf.mxu1  ;;  %2011 = vmatprep.subr.bf16.mxu1 %v2087_v50 }
 0x248   : > { %1967 = vmatprep.mubr.bf16.mxu1 %v907_v14  ;;  %v899_v25 = vmax.f32 %v872_v16, 0.0 }
 0x249   : > { %v1942_v18 = vpop.f32.mrf.mxu1  ;;  %1968 = vmatmul.mubr.bf16.gmra.mxu1 %v908_v15 }
 0x24a   : > { %v902_v19 = vmax.f32 %v1942_v18, 0.0  ;;  %2019 = vmatpush1.bf16.msra.mxu1 %v2085_v51 }
 0x24b   : > { %v875_v24 = vpop.f32.mrf.mxu1 }
 0x24c   : > { %v900_v17 = vmax.f32 %v875_v24, 0.0  ;;  %v910_v37 = vpack.c.bf16 %v902_v19, %v901_v28  ;;  %v2094_v19 = vld [vmem:[%s2179_s16] ss:$8 sps:$4 sm:$0xff]  }
 0x24e   : > { %v909_v36 = vpack.c.bf16 %v900_v17, %v899_v25  ;;  %v1761_v25 = vld [vmem:[%s2164_s7] sm:$0xff]  }
 0x250   : > { %1971 = vmatprep.mubr.bf16.mxu1 %v909_v36  ;;  %v1762_v36 = vunpack.c.l.bf16 %v1761_v25 }
 0x251   : > { %1972 = vmatmul.mubr.bf16.gmra.mxu1 %v910_v37  ;;  %v1763_v37 = vunpack.c.h.bf16 %v1761_v25 }
 0x2f9   : > { %v1961_v52 = vpop.f32.mrf.mxu1 }
 0x2fb   : > { %v1009_v53 = vpop.f32.mrf.mxu1 }
 0x2fd   : > { %v1962_v56 = vpop.f32.mrf.mxu1 }
 0x2fe   : > { %v1073_v16 = vpack.c.bf16 %v1962_v56, %v1961_v52 }
 0x2ff   : > { %v1012_v57 = vpop.f32.mrf.mxu1 }
 0x300   : > { %v1072_v18 = vpack.c.bf16 %v1012_v57, %v1009_v53 }
 0x301   : > { %v1965_v58 = vpop.f32.mrf.mxu1 }
 0x303   : > { %v1025_v59 = vpop.f32.mrf.mxu1 }
 0x305   : > { %v1966_v62 = vpop.f32.mrf.mxu1 }
 0x306   : > { %v1075_v14 = vpack.c.bf16 %v1966_v62, %v1965_v58 }
 0x307   : > { %v1028_v63 = vpop.f32.mrf.mxu1 }
 0x308   : > { %v1074_v15 = vpack.c.bf16 %v1028_v63, %v1025_v59 }
 0x309   : > { %v1969_v0 = vpop.f32.mrf.mxu1 }
 0x30b   : > { %v1041_v1 = vpop.f32.mrf.mxu1 }
 0x30d   : > { %v1970_v4 = vpop.f32.mrf.mxu1 }
 0x30e   : > { %v1077_v12 = vpack.c.bf16 %v1970_v4, %v1969_v0 }
 0x30f   : > { %v1044_v5 = vpop.f32.mrf.mxu1 }
 0x310   : > { %v1076_v13 = vpack.c.bf16 %v1044_v5, %v1041_v1 }
 0x311   : > { %v1973_v6 = vpop.f32.mrf.mxu1 }
 0x313   : > { %v1057_v7 = vpop.f32.mrf.mxu1 }
 0x315   : > { %v1974_v8 = vpop.f32.mrf.mxu1 }
 0x316   : > { %v1079_v9 = vpack.c.bf16 %v1974_v8, %v1973_v6  ;;  %v1794_v8 = vld [vmem:[%s2164_s7 + $0x18] sm:$0xff]  }
 0x317   : > { %v1060_v10 = vpop.f32.mrf.mxu1 }
 0x318   : > { %v1078_v11 = vpack.c.bf16 %v1060_v10, %v1057_v7  ;;  %1975 = vmatprep.subr.bf16.mxu0 %v1079_v9 }
 0x319   : > { %1976 = vmatpush3.bf16.msra.mxu0 %v1079_v9 }
 0x31a   : > { %1977 = vmatprep.subr.bf16.mxu0 %v1078_v11 }
 0x31d   : > { %1978 = vmatpush3.bf16.msra.mxu0 %v1078_v11  ;;  %v1775_v11 = vunpack.c.h.bf16 %v1794_v8 }
 0x31e   : > { %1979 = vmatprep.subr.bf16.mxu0 %v1077_v12 }
 0x321   : > { %1980 = vmatpush3.bf16.msra.mxu0 %v1077_v12 }
 0x322   : > { %1981 = vmatprep.subr.bf16.mxu0 %v1076_v13 }
 0x325   : > { %1982 = vmatpush3.bf16.msra.mxu0 %v1076_v13 }
 0x326   : > { %1983 = vmatprep.subr.bf16.mxu0 %v1075_v14 }
 0x329   : > { %1984 = vmatpush3.bf16.msra.mxu0 %v1075_v14 }
 0x32a   : > { %1985 = vmatprep.subr.bf16.mxu0 %v1074_v15 }
 0x32d   : > { %1986 = vmatpush3.bf16.msra.mxu0 %v1074_v15 }
 0x32e   : > { %1987 = vmatprep.subr.bf16.mxu0 %v1073_v16 }
 0x331   : > { %1988 = vmatpush3.bf16.msra.mxu0 %v1073_v16  ;;  %v1774_v16 = vunpack.c.l.bf16 %v1794_v8 }
 0x332   : > { %1989 = vmatprep.subr.bf16.mxu0 %v1072_v18 }
 0x335   : > { %1990 = vmatpush3.bf16.msra.mxu0 %v1072_v18 }
 0x336   : > { %1345 = vmatprep.subr.bf16.mxu0 %v2075_v38 }
 0x338   : > { %1992 = vmatmul.mubr.bf16.vlgmr.msra.gmra.mxu0 %v2330_v22  ;;  %v2090_v22 = vld [vmem:[%s2179_s16 + $0x24] ss:$8 sps:$4 sm:$0xff]  }
 0x339   : > { %1995 = vmatprep.mubr.bf16.mxu0 %v2333_v23  ;;  %1346 = vmatpush1.bf16.msra.mxu0 %v2073_v39  ;;  %v2088_v23 = vld [vmem:[%s2179_s16 + $0x20] ss:$8 sps:$4 sm:$0xff]  }
 0x33a   : > { %1347 = vmatprep.subr.bf16.mxu0 %v2078_v40  ;;  %2012 = vmatprep.subr.bf16.mxu1 %v2090_v22 }
 0x33b   : > { %2020 = vmatpush1.bf16.msra.mxu1 %v2088_v23 }
 0x33d   : > { %1348 = vmatpush1.bf16.msra.mxu0 %v2076_v43  ;;  %v1792_v43 = vld [vmem:[%s2164_s7 + $0x8] sm:$0xff]  }
 0x33e   : > { %1349 = vmatprep.subr.bf16.mxu0 %v2081_v44  ;;  %v1766_v53 = vunpack.c.l.bf16 %v1792_v43 }
 0x340   : > { %1996 = vmatmul.mubr.bf16.gmra.mxu0 %v2339_v26  ;;  %v2093_v26 = vld [vmem:[%s2179_s16 + $0x14] ss:$8 sps:$4 sm:$0xff]  }
 0x341   : > { %1999 = vmatprep.mubr.bf16.mxu0 %v2341_v27  ;;  %1350 = vmatpush1.bf16.msra.mxu0 %v2079_v45  ;;  %v2091_v27 = vld [vmem:[%s2179_s16 + $0x10] ss:$8 sps:$4 sm:$0xff]  }
 0x342   : > { %1351 = vmatprep.subr.bf16.mxu0 %v2084_v46  ;;  %2013 = vmatprep.subr.bf16.mxu1 %v2093_v26 }
 0x343   : > { %2021 = vmatpush1.bf16.msra.mxu1 %v2091_v27 }
 0x345   : > { %1352 = vmatpush1.bf16.msra.mxu0 %v2082_v47  ;;  %v1793_v47 = vld [vmem:[%s2164_s7 + $0x10] sm:$0xff]  }
 0x346   : > { %1353 = vmatprep.subr.bf16.mxu0 %v2087_v50  ;;  %v1770_v59 = vunpack.c.l.bf16 %v1793_v47  ;;  %v1771_v62 = vunpack.c.h.bf16 %v1793_v47 }
 0x348   : > { %2000 = vmatmul.mubr.bf16.gmra.mxu0 %v2347_v31  ;;  %v2096_v31 = vld [vmem:[%s2179_s16 + $0x4] ss:$8 sps:$4 sm:$0xff]  }
 0x349   : > { %2003 = vmatprep.mubr.bf16.mxu0 %v2349_v32  ;;  %1354 = vmatpush1.bf16.msra.mxu0 %v2085_v51  ;;  %v2108_v32 = vmov 0   ;;  %v1767_v51 = vunpack.c.h.bf16 %v1792_v43 }
 0x34a   : > { %1355 = vmatprep.subr.bf16.mxu0 %v2090_v22  ;;  %2014 = vmatprep.subr.bf16.mxu1 %v2096_v31  ;;  %v1795_v22 = vld [vmem:[%s2164_s7 + $0x20] sm:$0xff]  }
 0x34b   : > { %2022 = vmatpush1.bf16.msra.mxu1 %v2094_v19  ;;  %1397 = vmatprep.mubr.bf16.mxu1 %v2108_v32 }
 0x34d   : > { %1356 = vmatpush1.bf16.msra.mxu0 %v2088_v23 }
 0x34e   : > { %1357 = vmatprep.subr.bf16.mxu0 %v2093_v26 }
 0x350   : > { %2004 = vmatmul.mubr.bf16.gmra.mxu0 %v2353_v33 }
 0x351   : > { %1358 = vmatpush1.bf16.msra.mxu0 %v2091_v27  ;;  %1377 = vmatprep.mubr.bf16.mxu0 %v2108_v32  ;;  %v1778_v27 = vunpack.c.l.bf16 %v1795_v22 }
 0x352   : > { %1359 = vmatprep.subr.bf16.mxu0 %v2096_v31 }
 0x355   : > { %1360 = vmatpush1.bf16.msra.mxu0 %v2094_v19 }
 0x3f8   : > { %v1993_v33 = vpop.f32.mrf.mxu0 }
 0x3f9   : > { %v1179_v57 = vmax.f32 %v1993_v33, 0.0 }
 0x3fa   : > { %v1114_v24 = vpop.f32.mrf.mxu0 }
 0x3fb   : > { %v1177_v28 = vmax.f32 %v1114_v24, 0.0  ;;  %v1227_v5 = vadd.f32 %v1766_v53, %v1179_v57  ;;  %v1779_v24 = vunpack.c.h.bf16 %v1795_v22 }
 0x3fc   : > { %v1994_v17 = vpop.f32.mrf.mxu0 }
 0x3fd   : > { %v1225_v44 = vadd.f32 %v1762_v36, %v1177_v28  ;;  %v1180_v50 = vmax.f32 %v1994_v17, 0.0  ;;  %v1796_v17 = vld [vmem:[%s2164_s7 + $0x28] sm:$0xff]  }
 0x3fe   : > { %v1117_v38 = vpop.f32.mrf.mxu0  ;;  %v1783_v43 = vunpack.c.h.bf16 %v1796_v17 }
 0x3ff   : > { %v1178_v39 = vmax.f32 %v1117_v38, 0.0  ;;  %v1228_v0 = vadd.f32 %v1767_v51, %v1180_v50  ;;  %v1782_v38 = vunpack.c.l.bf16 %v1796_v17  ;;  %v1797_v50 = vld [vmem:[%s2164_s7 + $0x30] sm:$0xff]  }
 0x400   : > { %v1997_v40 = vpop.f32.mrf.mxu0 }
 0x401   : > { %v1226_v45 = vadd.f32 %v1763_v37, %v1178_v39  ;;  %v1242_v13 = vpack.c.bf16 %v1228_v0, %v1227_v5  ;;  %v1183_v15 = vmax.f32 %v1997_v40, 0.0 }
 0x402   : > { %v1130_v46 = vpop.f32.mrf.mxu0 }
 0x403   : > { %v1241_v52 = vpack.c.bf16 %v1226_v45, %v1225_v44  ;;  %v1181_v58 = vmax.f32 %v1130_v46, 0.0  ;;  %v1231_v26 = vadd.f32 %v1774_v16, %v1183_v15  ;;  %v1491_v16 = vld [vmem:[%s2616_s6 + $0x8] sm:$0xff] }
 0x404   : > { %v1998_v56 = vpop.f32.mrf.mxu0 }
 0x405   : > { %1378 = vmatmul.mubr.bf16.vlgmr.msra.gmra.mxu0 %v1241_v52  ;;  %v1229_v6 = vadd.f32 %v1770_v59, %v1181_v58  ;;  %v1184_v10 = vmax.f32 %v1998_v56, 0.0  ;;  %v1786_v52 = vunpack.c.l.bf16 %v1797_v50  ;;  %v1787_v58 = vunpack.c.h.bf16 %v1797_v50  ;;  %v1798_v59 = vld [vmem:[%s2164_s7 + $0x38] sm:$0xff]  }
 0x406   : > { %v1133_v63 = vpop.f32.mrf.mxu0  ;;  %1387 = vmatprep.mubr.bf16.mxu0 %v2108_v32  ;;  %v1790_v0 = vunpack.c.l.bf16 %v1798_v59  ;;  %v1791_v5 = vunpack.c.h.bf16 %v1798_v59  ;;  %v1497_v50 = vld [vmem:[%s2616_s6 + $0x38] sm:$0xff] }
 0x407   : > { %v1182_v1 = vmax.f32 %v1133_v63, 0.0  ;;  %v1232_v18 = vadd.f32 %v1775_v11, %v1184_v10  ;;  %v1490_v11 = vld [vmem:[%s2616_s6] sm:$0xff] }
 0x408   : > { %v2001_v4 = vpop.f32.mrf.mxu0 }
 0x409   : > { %v1230_v7 = vadd.f32 %v1771_v62, %v1182_v1  ;;  %v1244_v19 = vpack.c.bf16 %v1232_v18, %v1231_v26  ;;  %v1187_v39 = vmax.f32 %v2001_v4, 0.0 }
 0x40a   : > { %v1146_v9 = vpop.f32.mrf.mxu0 }
 0x40b   : > { %v1243_v12 = vpack.c.bf16 %v1230_v7, %v1229_v6  ;;  %v1185_v31 = vmax.f32 %v1146_v9, 0.0  ;;  %v1235_v46 = vadd.f32 %v1782_v38, %v1187_v39 }
 0x40c   : > { %v2002_v14 = vpop.f32.mrf.mxu0 }
 0x40d   : > { %1388 = vmatmul.mubr.bf16.gmra.mxu0 %v1242_v13  ;;  %1398 = vmatmul.mubr.bf16.vlgmr.msra.gmra.mxu1 %v1243_v12  ;;  %v1233_v28 = vadd.f32 %v1778_v27, %v1185_v31  ;;  %v1188_v40 = vmax.f32 %v2002_v14, 0.0  ;;  %v1494_v27 = vld [vmem:[%s2616_s6 + $0x20] sm:$0xff] }
 0x40e   : > { %1407 = vmatprep.mubr.bf16.mxu1 %v2108_v32  ;;  %v1149_v23 = vpop.f32.mrf.mxu0 }
 0x40f   : > { %v1186_v33 = vmax.f32 %v1149_v23, 0.0  ;;  %v1236_v47 = vadd.f32 %v1783_v43, %v1188_v40 }
 0x410   : > { %v2005_v25 = vpop.f32.mrf.mxu0 }
 0x411   : > { %v1234_v36 = vadd.f32 %v1779_v24, %v1186_v33  ;;  %v1246_v56 = vpack.c.bf16 %v1236_v47, %v1235_v46  ;;  %v1191_v1 = vmax.f32 %v2005_v25, 0.0 }
 0x412   : > { %v1162_v37 = vpop.f32.mrf.mxu0 }
 0x413   : > { %v1245_v44 = vpack.c.bf16 %v1234_v36, %v1233_v28  ;;  %v1189_v53 = vmax.f32 %v1162_v37, 0.0  ;;  %v1239_v7 = vadd.f32 %v1790_v0, %v1191_v1  ;;  %v1493_v36 = vld [vmem:[%s2616_s6 + $0x18] sm:$0xff]  ;;  %v1495_v37 = vld [vmem:[%s2616_s6 + $0x28] sm:$0xff] }
 0x414   : > { %v2006_v45 = vpop.f32.mrf.mxu0 }
 0x415   : > { %1408 = vmatmul.mubr.bf16.gmra.mxu1 %v1244_v19  ;;  %v1237_v62 = vadd.f32 %v1786_v52, %v1189_v53  ;;  %v1192_v4 = vmax.f32 %v2006_v45, 0.0  ;;  %v1496_v45 = vld [vmem:[%s2616_s6 + $0x30] sm:$0xff] }
 0x416   : > { %1417 = vmatprep.mubr.bf16.mxu1 %v2108_v32  ;;  %v1165_v51 = vpop.f32.mrf.mxu0 }
 0x417   : > { %v1190_v57 = vmax.f32 %v1165_v51, 0.0  ;;  %v1240_v8 = vadd.f32 %v1791_v5, %v1192_v4 }
 0x419   : > { %v1238_v63 = vadd.f32 %v1787_v58, %v1190_v57  ;;  %v1248_v9 = vpack.c.bf16 %v1240_v8, %v1239_v7 }
 0x41b   : > { %v1247_v6 = vpack.c.bf16 %v1238_v63, %v1237_v62 }
 0x41d   : > { %1418 = vmatmul.mubr.bf16.gmra.mxu1 %v1245_v44 }
 0x41e   : > { %1427 = vmatprep.mubr.bf16.mxu1 %v2108_v32 }
 0x425   : > { %1428 = vmatmul.mubr.bf16.gmra.mxu1 %v1246_v56 }
 0x426   : > { %1437 = vmatprep.mubr.bf16.mxu1 %v2108_v32 }
 0x42d   : > { %1438 = vmatmul.mubr.bf16.gmra.mxu1 %v1247_v6 }
 0x42e   : > { %1447 = vmatprep.mubr.bf16.mxu1 %v2108_v32 }
 0x435   : > { %1448 = vmatmul.mubr.bf16.gmra.mxu1 %v1248_v9 }
 0x4c5   : > { %v1379_v10 = vpop.f32.mrf.mxu0 }
 0x4c6   : > { %v1458_v12 = vadd.f32 %v1379_v10, %v2265_v20  ;;  %v1492_v20 = vld [vmem:[%s2616_s6 + $0x10] sm:$0xff] }
 0x4c7   : > { %v1381_v13 = vpop.f32.mrf.mxu0 }
 0x4c8   : > { %1474 = vst [vmem:[#allocation4 + $0x30] sm:$0xff] %v1458_v12  ;;  %v1506_v14 = vadd.f32 %v1490_v11, %v1381_v13 }
 0x4c9   : > { %v1383_v15 = vpop.f32.mrf.mxu0 }
 0x4ca   : > { %1522 = vst [vmem:[%s2616_s6] sm:$0xff] %v1506_v14  ;;  %v1459_v32 = vadd.f32 %v1383_v15, %v2267_v21 }
 0x4cb   : > { %v1385_v18 = vpop.f32.mrf.mxu0 }
 0x4cc   : > { %1475 = vst [vmem:[#allocation4] sm:$0xff] %v1459_v32  ;;  %v1507_v22 = vadd.f32 %v1491_v16, %v1385_v18 }
 0x4cd   : > { %v1389_v23 = vpop.f32.mrf.mxu0  ;;  %v1399_v26 = vpop.f32.mrf.mxu1 }
 0x4ce   : > { %1523 = vst [vmem:[%s2616_s6 + $0x8] sm:$0xff] %v1507_v22  ;;  %v1460_v31 = vadd.f32 %v1389_v23, %v2275_v29  ;;  %v1462_v21 = vadd.f32 %v1399_v26, %v2282_v34 }
 0x4cf   : > { %v1391_v19 = vpop.f32.mrf.mxu0  ;;  %v1401_v33 = vpop.f32.mrf.mxu1 }
 0x4d0   : > { %1476 = vst [vmem:[#allocation4 + $0x58] sm:$0xff] %v1460_v31  ;;  %1478 = vst [vmem:[#allocation4 + $0x50] sm:$0xff] %v1462_v21  ;;  %v1508_v24 = vadd.f32 %v1492_v20, %v1391_v19  ;;  %v1510_v25 = vadd.f32 %v1494_v27, %v1401_v33 }
 0x4d1   : > { %v1393_v17 = vpop.f32.mrf.mxu0  ;;  %v1403_v28 = vpop.f32.mrf.mxu1 }
 0x4d2   : > { %1524 = vst [vmem:[%s2616_s6 + $0x10] sm:$0xff] %v1508_v24  ;;  %1526 = vst [vmem:[%s2616_s6 + $0x20] sm:$0xff] %v1510_v25  ;;  %v1461_v29 = vadd.f32 %v1393_v17, %v2277_v30  ;;  %v1463_v34 = vadd.f32 %v1403_v28, %v2284_v35 }
 0x4d3   : > { %v1395_v38 = vpop.f32.mrf.mxu0  ;;  %v1405_v39 = vpop.f32.mrf.mxu1 }
 0x4d4   : > { %1477 = vst [vmem:[#allocation4 + $0x18] sm:$0xff] %v1461_v29  ;;  %1479 = vst [vmem:[#allocation4 + $0x68] sm:$0xff] %v1463_v34  ;;  %v1509_v40 = vadd.f32 %v1493_v36, %v1395_v38  ;;  %v1511_v43 = vadd.f32 %v1495_v37, %v1405_v39 }
 0x4d5   : > { %v1409_v44 = vpop.f32.mrf.mxu1 }
 0x4d6   : > { %1525 = vst [vmem:[%s2616_s6 + $0x18] sm:$0xff] %v1509_v40  ;;  %1527 = vst [vmem:[%s2616_s6 + $0x28] sm:$0xff] %v1511_v43  ;;  %v1464_v30 = vadd.f32 %v1409_v44, %v2290_v41  ;;  %v1498_v41 = vld [vmem:[%s2616_s6 + $0x40] sm:$0xff] }
 0x4d7   : > { %v1411_v35 = vpop.f32.mrf.mxu1 }
 0x4d8   : > { %1480 = vst [vmem:[#allocation4 + $0x8] sm:$0xff] %v1464_v30  ;;  %v1512_v46 = vadd.f32 %v1496_v45, %v1411_v35 }
 0x4d9   : > { %v1413_v47 = vpop.f32.mrf.mxu1 }
 0x4da   : > { %1528 = vst [vmem:[%s2616_s6 + $0x30] sm:$0xff] %v1512_v46  ;;  %v1465_v51 = vadd.f32 %v1413_v47, %v2292_v42  ;;  %v1499_v42 = vld [vmem:[%s2616_s6 + $0x48] sm:$0xff] }
 0x4db   : > { %v1415_v52 = vpop.f32.mrf.mxu1 }
 0x4dc   : > { %1481 = vst [vmem:[#allocation4 + $0x48] sm:$0xff] %v1465_v51  ;;  %v1513_v53 = vadd.f32 %v1497_v50, %v1415_v52 }
 0x4dd   : > { %v1419_v56 = vpop.f32.mrf.mxu1 }
 0x4de   : > { %1529 = vst [vmem:[%s2616_s6 + $0x38] sm:$0xff] %v1513_v53  ;;  %v1466_v57 = vadd.f32 %v1419_v56, %v2297_v48  ;;  %v1500_v48 = vld [vmem:[%s2616_s6 + $0x50] sm:$0xff] }
 0x4df   : > { %v1421_v58 = vpop.f32.mrf.mxu1 }
 0x4e0   : > { %1482 = vst [vmem:[#allocation4 + $0x40] sm:$0xff] %v1466_v57  ;;  %v1514_v59 = vadd.f32 %v1498_v41, %v1421_v58 }
 0x4e1   : > { %v1423_v62 = vpop.f32.mrf.mxu1 }
 0x4e2   : > { %1530 = vst [vmem:[%s2616_s6 + $0x40] sm:$0xff] %v1514_v59  ;;  %v1467_v63 = vadd.f32 %v1423_v62, %v2299_v49  ;;  %v1501_v49 = vld [vmem:[%s2616_s6 + $0x58] sm:$0xff] }
 0x4e3   : > { %v1425_v0 = vpop.f32.mrf.mxu1 }
 0x4e4   : > { %1483 = vst [vmem:[#allocation4 + $0x20] sm:$0xff] %v1467_v63  ;;  %v1515_v1 = vadd.f32 %v1499_v42, %v1425_v0 }
 0x4e5   : > { %v1429_v4 = vpop.f32.mrf.mxu1 }
 0x4e6   : > { %1531 = vst [vmem:[%s2616_s6 + $0x48] sm:$0xff] %v1515_v1  ;;  %v1468_v5 = vadd.f32 %v1429_v4, %v2304_v54  ;;  %v1502_v54 = vld [vmem:[%s2616_s6 + $0x60] sm:$0xff] }
 0x4e7   : > { %v1431_v6 = vpop.f32.mrf.mxu1 }
 0x4e8   : > { %1484 = vst [vmem:[#allocation4 + $0x10] sm:$0xff] %v1468_v5  ;;  %v1516_v7 = vadd.f32 %v1500_v48, %v1431_v6 }
 0x4e9   : > { %v1433_v8 = vpop.f32.mrf.mxu1 }
 0x4ea   : > { %1532 = vst [vmem:[%s2616_s6 + $0x50] sm:$0xff] %v1516_v7  ;;  %v1469_v9 = vadd.f32 %v1433_v8, %v2306_v55  ;;  %v1503_v55 = vld [vmem:[%s2616_s6 + $0x68] sm:$0xff] }
 0x4eb   : > { %v1435_v10 = vpop.f32.mrf.mxu1 }
 0x4ec   : > { %1485 = vst [vmem:[#allocation4 + $0x38] sm:$0xff] %v1469_v9  ;;  %v1517_v11 = vadd.f32 %v1501_v49, %v1435_v10 }
 0x4ed   : > { %v1439_v12 = vpop.f32.mrf.mxu1 }
 0x4ee   : > { %1533 = vst [vmem:[%s2616_s6 + $0x58] sm:$0xff] %v1517_v11  ;;  %v1470_v13 = vadd.f32 %v1439_v12, %v2311_v60  ;;  %v1504_v60 = vld [vmem:[%s2616_s6 + $0x70] sm:$0xff] }
 0x4ef   : > { %v1441_v14 = vpop.f32.mrf.mxu1 }
 0x4f0   : > { %1486 = vst [vmem:[#allocation4 + $0x60] sm:$0xff] %v1470_v13  ;;  %v1518_v15 = vadd.f32 %v1502_v54, %v1441_v14 }
 0x4f1   : > { %v1443_v16 = vpop.f32.mrf.mxu1 }
 0x4f2   : > { %1534 = vst [vmem:[%s2616_s6 + $0x60] sm:$0xff] %v1518_v15  ;;  %v1471_v32 = vadd.f32 %v1443_v16, %v2313_v61  ;;  %v1505_v61 = vld [vmem:[%s2616_s6 + $0x78] sm:$0xff] }
 0x4f3   : > { %v1445_v18 = vpop.f32.mrf.mxu1 }
 0x4f4   : > { %1487 = vst [vmem:[#allocation4 + $0x70] sm:$0xff] %v1471_v32  ;;  %v1519_v22 = vadd.f32 %v1503_v55, %v1445_v18 }
 0x4f5   : > { %v1449_v23 = vpop.f32.mrf.mxu1 }
 0x4f6   : > { %1535 = vst [vmem:[%s2616_s6 + $0x68] sm:$0xff] %v1519_v22  ;;  %v1472_v26 = vadd.f32 %v1449_v23, %v2318_v2 }
 0x4f7   : > { %v1451_v20 = vpop.f32.mrf.mxu1 }
 0x4f8   : > { %1488 = vst [vmem:[#allocation4 + $0x78] sm:$0xff] %v1472_v26  ;;  %v1520_v27 = vadd.f32 %v1504_v60, %v1451_v20 }
 0x4f9   : > { %v1453_v31 = vpop.f32.mrf.mxu1 }
 0x4fa   : > { %1536 = vst [vmem:[%s2616_s6 + $0x70] sm:$0xff] %v1520_v27  ;;  %v1473_v21 = vadd.f32 %v1453_v31, %v2320_v3  ;;  %1541 = sbr.rel (%p1751_p5) target bundleno = 1290 (0x50a), region = 82 }
 0x4fb   : > { %v1455_v19 = vpop.f32.mrf.mxu1 }
 0x4fc   : > { %1489 = vst [vmem:[#allocation4 + $0x28] sm:$0xff] %v1473_v21  ;;  %v1521_v33 = vadd.f32 %v1505_v61, %v1455_v19 }
 0x4fe   : > { %1537 = vst [vmem:[%s2616_s6 + $0x78] sm:$0xff] %v1521_v33 }
 0x4ff   : > { %v1542_v2 = vld [vmem:[%s2616_s6] sm:$0xff]  ;;  %v1543_v24 = vld [vmem:[%s2616_s6 + $0x8] sm:$0xff]  ;;  %v1544_v3 = vld [vmem:[%s2616_s6 + $0x10] sm:$0xff] }
 0x500   : > { %v1558_v25 = vmax.f32 %v1542_v2, 0.0  ;;  %v1559_v17 = vmax.f32 %v1543_v24, 0.0  ;;  %v1560_v28 = vmax.f32 %v1544_v3, 0.0  ;;  %v1545_v36 = vld [vmem:[%s2616_s6 + $0x18] sm:$0xff]  ;;  %v1546_v37 = vld [vmem:[%s2616_s6 + $0x20] sm:$0xff]  ;;  %v1547_v29 = vld [vmem:[%s2616_s6 + $0x28] sm:$0xff] }
 0x501   : > { %v1561_v34 = vmax.f32 %v1545_v36, 0.0  ;;  %v1562_v38 = vmax.f32 %v1546_v37, 0.0  ;;  %v1563_v39 = vmax.f32 %v1547_v29, 0.0  ;;  %v1548_v40 = vld [vmem:[%s2616_s6 + $0x30] sm:$0xff]  ;;  %v1549_v43 = vld [vmem:[%s2616_s6 + $0x38] sm:$0xff]  ;;  %v1550_v44 = vld [vmem:[%s2616_s6 + $0x40] sm:$0xff] }
 0x502   : > { %1574 = vst [vmem:[%s2616_s6] sm:$0xff] %v1558_v25  ;;  %1575 = vst [vmem:[%s2616_s6 + $0x8] sm:$0xff] %v1559_v17  ;;  %v1564_v45 = vmax.f32 %v1548_v40, 0.0  ;;  %v1565_v30 = vmax.f32 %v1549_v43, 0.0  ;;  %v1566_v35 = vmax.f32 %v1550_v44, 0.0  ;;  %v1551_v46 = vld [vmem:[%s2616_s6 + $0x48] sm:$0xff]  ;;  %v1552_v47 = vld [vmem:[%s2616_s6 + $0x50] sm:$0xff] }
 0x503   : > { %1576 = vst [vmem:[%s2616_s6 + $0x10] sm:$0xff] %v1560_v28  ;;  %v1553_v50 = vld [vmem:[%s2616_s6 + $0x58] sm:$0xff]  ;;  %1577 = vst [vmem:[%s2616_s6 + $0x18] sm:$0xff] %v1561_v34  ;;  %v1567_v51 = vmax.f32 %v1551_v46, 0.0  ;;  %v1568_v52 = vmax.f32 %v1552_v47, 0.0  ;;  %v1554_v56 = vld [vmem:[%s2616_s6 + $0x60] sm:$0xff] }
 0x504   : > { %1578 = vst [vmem:[%s2616_s6 + $0x20] sm:$0xff] %v1562_v38  ;;  %1579 = vst [vmem:[%s2616_s6 + $0x28] sm:$0xff] %v1563_v39  ;;  %v1569_v53 = vmax.f32 %v1553_v50, 0.0  ;;  %v1555_v41 = vld [vmem:[%s2616_s6 + $0x68] sm:$0xff]  ;;  %v1556_v57 = vld [vmem:[%s2616_s6 + $0x70] sm:$0xff]  ;;  %v1570_v58 = vmax.f32 %v1554_v56, 0.0 }
 0x505   : > { %1580 = vst [vmem:[%s2616_s6 + $0x30] sm:$0xff] %v1564_v45  ;;  %1581 = vst [vmem:[%s2616_s6 + $0x38] sm:$0xff] %v1565_v30  ;;  %v1571_v59 = vmax.f32 %v1555_v41, 0.0  ;;  %v1572_v62 = vmax.f32 %v1556_v57, 0.0  ;;  %v1557_v42 = vld [vmem:[%s2616_s6 + $0x78] sm:$0xff] }
 0x506   : > { %1582 = vst [vmem:[%s2616_s6 + $0x40] sm:$0xff] %v1566_v35  ;;  %1583 = vst [vmem:[%s2616_s6 + $0x48] sm:$0xff] %v1567_v51  ;;  %v1573_v63 = vmax.f32 %v1557_v42, 0.0 }
 0x507   : > { %1584 = vst [vmem:[%s2616_s6 + $0x50] sm:$0xff] %v1568_v52  ;;  %1585 = vst [vmem:[%s2616_s6 + $0x58] sm:$0xff] %v1569_v53 }
 0x508   : > { %1586 = vst [vmem:[%s2616_s6 + $0x60] sm:$0xff] %v1570_v58  ;;  %1587 = vst [vmem:[%s2616_s6 + $0x68] sm:$0xff] %v1571_v59 }
 0x509   : > { %1588 = vst [vmem:[%s2616_s6 + $0x70] sm:$0xff] %v1572_v62  ;;  %1589 = vst [vmem:[%s2616_s6 + $0x78] sm:$0xff] %v1573_v63 }
 0x50a PF: > { %s16_s21 = sadd.s32 1, %s2105_s21  }
 0x50b   : > { %p13_p6 = scmp.ge.s32.totalorder %s16_s21, 5  }
 0x50d   :  { %15 = sbr.rel (!%p13_p6) target bundleno = 1 (0x1), region = 128 }
 0x512   :  { %1601 = vsyncmov [#allocation3] }
 0x515   :  { %s1602_s25 = vpop.sfrf %1601 }
 0x516   :  { %p1754_p7 = scmp.ne.s32.totalorder %s1602_s25, 0 }
 0x518   :  { %1606 = shalt.err (%p1754_p7)  }

</bundles_post_ra>
